<compile_context>
chip_gen: v6e
topology: v6e:2x2x1
jax: 0.10.0
libtpu: 0.0.40
codegen_flags: <defaults>
</compile_context>

<pallas_src>
import functools

import jax
import jax.numpy as jnp
from jax.experimental import pallas as pl
from jax.experimental.pallas import tpu as pltpu


def _reorg_kernel(x_ref, o_ref, sa_ref, sb_ref, *, stride, hp, wp):
    s = stride
    tc, _hw = x_ref.shape
    Hp, Wp = hp, wp

    x = x_ref[...]                                       # (tc, H*W), lane-dense
    # 32-bit carrier so strided reads / transposes stay on the safe f32 path.
    # TODO(synk): 64-bit dtypes are not supported by this 32-bit carrier path.
    if x.dtype == jnp.float32:
        xc = x
    elif x.dtype.itemsize == 4:
        xc = pltpu.bitcast(x, jnp.float32)               # i32/u32: exact reinterpret
    else:
        xc = x.astype(jnp.float32)                       # bf16/f16/i8/...: exact upcast

    # Spatial index r = h*W + w on sublanes, channels on lanes.
    sa_ref[...] = xc.T                                   # (H*W, tc)

    for j in range(s):
        # Column offset j: since W % s == 0, rows with w % s == j are exactly
        # the rows r with r % s == j -> one sublane-strided read.
        yj = sa_ref[pl.ds(j, Hp * s * Wp, stride=s), :]  # (H*Wp, tc), rows = (h, wp)
        # Expose h = s*hp + i as its own leading axes (lane dim unchanged; for
        # Wp % 8 == 0 this is a no-op relayout).
        sb_ref[...] = yj.reshape(Hp, s, Wp, tc)
        for i in range(s):
            z = sb_ref[:, i, :, :]                       # (Hp, Wp, tc)
            zt = z.reshape(Hp * Wp, tc).T                # (tc, Hp*Wp), lane-dense
            if o_ref.dtype == jnp.float32:
                out = zt
            elif o_ref.dtype.itemsize == 4:
                out = pltpu.bitcast(zt, o_ref.dtype)
            else:
                out = zt.astype(o_ref.dtype)
            o_ref[i, j] = out


def _choose_tile_c(B, C, H, W, s, itemsize):
    """Largest channel tile that fits a conservative VMEM budget (all gens)."""
    Hp, Wp = H // s, W // s
    hw = H * W

    def pad(v, m):
        return -(-v // m) * m

    def vmem_bytes(tc):
        inb = 2 * pad(tc, 8) * pad(hw, 128) * itemsize                 # 2x buffered in block
        outb = 2 * s * s * pad(tc, 8) * pad(Hp * Wp, 128) * itemsize   # 2x buffered out block
        sa = pad(hw, 8) * pad(tc, 128) * 4
        sb = Hp * s * pad(Wp, 8) * pad(tc, 128) * 4
        return inb + outb + sa + sb

    budget = 10 * 1024 * 1024  # well under v5e's 16 MiB / v7x's 32 MiB scoped defaults
    cands = sorted({c for c in (1024, 512, 256, 128, 64, 32, 16, 8)
                    if c <= C and C % c == 0} | {C}, reverse=True)
    fits = [tc for tc in cands
            if (tc == C or tc % 8 == 0) and vmem_bytes(tc) <= budget]
    if not fits:
        fits = [min(cands)]
    # Prefer a tile that leaves >= 2 grid steps so both v7x TensorCores get work.
    for tc in fits:
        if B * (C // tc) >= 2:
            return tc
    return fits[0]


def reorg(x, stride=2):
    B, C, H, W = x.shape
    s = stride
    assert H % s == 0 and W % s == 0, "H and W must be divisible by the stride"
    Hp, Wp = H // s, W // s

    tile_c = _choose_tile_c(B, C, H, W, s, x.dtype.itemsize)
    n_ct = C // tile_c

    kernel = functools.partial(_reorg_kernel, stride=s, hp=Hp, wp=Wp)

    # Pure mem-bound permutation: ~0 flops, 2x the array of HBM traffic.
    bytes_accessed = 2 * B * C * H * W * x.dtype.itemsize

    out5 = pl.pallas_call(
        kernel,
        out_shape=jax.ShapeDtypeStruct((B, s, s, C, Hp * Wp), x.dtype),
        grid_spec=pltpu.PrefetchScalarGridSpec(
            num_scalar_prefetch=0,
            grid=(B, n_ct),
            in_specs=[
                pl.BlockSpec((None, tile_c, H * W), lambda b, ci: (b, ci, 0)),
            ],
            out_specs=pl.BlockSpec((None, s, s, tile_c, Hp * Wp),
                                   lambda b, ci: (b, 0, 0, ci, 0)),
            scratch_shapes=[
                pltpu.VMEM((H * W, tile_c), jnp.float32),       # transposed block
                pltpu.VMEM((Hp, s, Wp, tile_c), jnp.float32),   # after column select
            ],
        ),
        compiler_params=pltpu.CompilerParams(
            dimension_semantics=("parallel", "parallel"),
            vmem_limit_bytes=32 * 1024 * 1024,
        ),
        cost_estimate=pl.CostEstimate(
            flops=0, transcendentals=0, bytes_accessed=bytes_accessed),
    )(x.reshape(B, C, H * W))

    # (B, i, j, C, Hp*Wp) -> (B, s*s*C, Hp, Wp): pure row-major view,
    # channel = (i*s + j)*C + c.
    return out5.reshape(B, s * s * C, Hp, Wp)


def reorg_reference(x, stride=2):
    """Pure-JAX reference with identical semantics to the PyTorch module."""
    B, C, H, W = x.shape
    s = stride
    Hp, Wp = H // s, W // s
    y = x.reshape(B, C, Hp, s, Wp, s)
    y = jnp.transpose(y, (0, 3, 5, 1, 2, 4))            # (B, i, j, C, Hp, Wp)
    return y.reshape(B, s * s * C, Hp, Wp)


if __name__ == "__main__":
    key = jax.random.PRNGKey(0)
    x = jax.random.normal(key, (2, 4, 16, 16), dtype=jnp.float32)

    out = jax.block_until_ready(reorg(x, stride=2))
    ref = reorg_reference(x, stride=2)

    assert out.shape == (2, 16, 8, 8), out.shape
    # Pure data movement: must match the reference bit-for-bit.
    assert bool(jnp.array_equal(out, ref)), float(jnp.max(jnp.abs(out - ref)))

    print("KERNEL_OK")
</pallas_src>

<mosaic_0001>
module attributes {stable_mosaic.version = 11 : i64} {
  func.func @_reorg_kernel(%arg0: i32, %arg1: i32, %arg2: memref<1x4x256xf32, #tpu.memory_space<vmem>>, %arg3: memref<1x2x2x4x64xf32, #tpu.memory_space<vmem>>, %arg4: memref<256x4xf32, #tpu.memory_space<vmem>>, %arg5: memref<8x2x8x4xf32, #tpu.memory_space<vmem>>) attributes {dimension_semantics = [#tpu.dimension_semantics<parallel>, #tpu.dimension_semantics<parallel>], iteration_bounds = array<i64: 2, 1>, scalar_prefetch = 0 : i64, scratch_operands = 2 : i64, tpu.core_type = #tpu.core_type<tc>, window_params = [{transform_indices = @transform_0, window_bounds = array<i64: 1, 4, 256>}, {transform_indices = @transform_1, window_bounds = array<i64: 1, 2, 2, 4, 64>}]} {
    %c0 = arith.constant 0 : index
    %c0_0 = arith.constant 0 : index
    %c0_1 = arith.constant 0 : index
    %0 = vector.load %arg2[%c0, %c0_0, %c0_1] : memref<1x4x256xf32, #tpu.memory_space<vmem>>, vector<1x4x256xf32>
    %1 = vector.shape_cast %0 : vector<1x4x256xf32> to vector<4x256xf32>
    %2 = tpu.transpose %1, [1, 0] : vector<4x256xf32> -> vector<256x4xf32>
    %c0_2 = arith.constant 0 : index
    %c0_3 = arith.constant 0 : index
    %3 = vector.load %arg4[%c0_2, %c0_3] : memref<256x4xf32, #tpu.memory_space<vmem>>, vector<256x4xf32>
    tpu.vector_store %arg4[%c0_2, %c0_3], %2 {strides = array<i32>} : memref<256x4xf32, #tpu.memory_space<vmem>>, vector<256x4xf32>,
    %c0_4 = arith.constant 0 : index
    %c0_5 = arith.constant 0 : index
    %4 = tpu.strided_load %arg4[%c0_4, %c0_5] {strides = array<i32: 2, 1>} : memref<256x4xf32, #tpu.memory_space<vmem>>, vector<128x4xf32>
    %5 = vector.shape_cast %4 : vector<128x4xf32> to vector<8x2x8x4xf32>
    %c0_6 = arith.constant 0 : index
    %c0_7 = arith.constant 0 : index
    %c0_8 = arith.constant 0 : index
    %c0_9 = arith.constant 0 : index
    %6 = vector.load %arg5[%c0_6, %c0_7, %c0_8, %c0_9] : memref<8x2x8x4xf32, #tpu.memory_space<vmem>>, vector<8x2x8x4xf32>
    tpu.vector_store %arg5[%c0_6, %c0_7, %c0_8, %c0_9], %5 {strides = array<i32>} : memref<8x2x8x4xf32, #tpu.memory_space<vmem>>, vector<8x2x8x4xf32>,
    %c0_10 = arith.constant 0 : index
    %c0_11 = arith.constant 0 : index
    %c0_12 = arith.constant 0 : index
    %c0_13 = arith.constant 0 : index
    %7 = vector.load %arg5[%c0_10, %c0_11, %c0_12, %c0_13] : memref<8x2x8x4xf32, #tpu.memory_space<vmem>>, vector<8x1x8x4xf32>
    %8 = vector.shape_cast %7 : vector<8x1x8x4xf32> to vector<8x8x4xf32>
    %9 = vector.shape_cast %8 : vector<8x8x4xf32> to vector<64x4xf32>
    %10 = tpu.transpose %9, [1, 0] : vector<64x4xf32> -> vector<4x64xf32>
    %c0_14 = arith.constant 0 : index
    %c0_15 = arith.constant 0 : index
    %c0_16 = arith.constant 0 : index
    %c0_17 = arith.constant 0 : index
    %c0_18 = arith.constant 0 : index
    %11 = vector.load %arg3[%c0_14, %c0_15, %c0_16, %c0_17, %c0_18] : memref<1x2x2x4x64xf32, #tpu.memory_space<vmem>>, vector<1x1x1x4x64xf32>
    %12 = vector.shape_cast %11 : vector<1x1x1x4x64xf32> to vector<4x64xf32>
    %13 = vector.shape_cast %10 : vector<4x64xf32> to vector<1x1x1x4x64xf32>
    tpu.vector_store %arg3[%c0_14, %c0_15, %c0_16, %c0_17, %c0_18], %13 {strides = array<i32>} : memref<1x2x2x4x64xf32, #tpu.memory_space<vmem>>, vector<1x1x1x4x64xf32>,
    %c0_19 = arith.constant 0 : index
    %c1 = arith.constant 1 : index
    %c0_20 = arith.constant 0 : index
    %c0_21 = arith.constant 0 : index
    %14 = vector.load %arg5[%c0_19, %c1, %c0_20, %c0_21] : memref<8x2x8x4xf32, #tpu.memory_space<vmem>>, vector<8x1x8x4xf32>
    %15 = vector.shape_cast %14 : vector<8x1x8x4xf32> to vector<8x8x4xf32>
    %16 = vector.shape_cast %15 : vector<8x8x4xf32> to vector<64x4xf32>
    %17 = tpu.transpose %16, [1, 0] : vector<64x4xf32> -> vector<4x64xf32>
    %c0_22 = arith.constant 0 : index
    %c1_23 = arith.constant 1 : index
    %c0_24 = arith.constant 0 : index
    %c0_25 = arith.constant 0 : index
    %c0_26 = arith.constant 0 : index
    %18 = vector.load %arg3[%c0_22, %c1_23, %c0_24, %c0_25, %c0_26] : memref<1x2x2x4x64xf32, #tpu.memory_space<vmem>>, vector<1x1x1x4x64xf32>
    %19 = vector.shape_cast %18 : vector<1x1x1x4x64xf32> to vector<4x64xf32>
    %20 = vector.shape_cast %17 : vector<4x64xf32> to vector<1x1x1x4x64xf32>
    tpu.vector_store %arg3[%c0_22, %c1_23, %c0_24, %c0_25, %c0_26], %20 {strides = array<i32>} : memref<1x2x2x4x64xf32, #tpu.memory_space<vmem>>, vector<1x1x1x4x64xf32>,
    %c1_27 = arith.constant 1 : index
    %c0_28 = arith.constant 0 : index
    %21 = tpu.strided_load %arg4[%c1_27, %c0_28] {strides = array<i32: 2, 1>} : memref<256x4xf32, #tpu.memory_space<vmem>>, vector<128x4xf32>
    %22 = vector.shape_cast %21 : vector<128x4xf32> to vector<8x2x8x4xf32>
    %c0_29 = arith.constant 0 : index
    %c0_30 = arith.constant 0 : index
    %c0_31 = arith.constant 0 : index
    %c0_32 = arith.constant 0 : index
    %23 = vector.load %arg5[%c0_29, %c0_30, %c0_31, %c0_32] : memref<8x2x8x4xf32, #tpu.memory_space<vmem>>, vector<8x2x8x4xf32>
    tpu.vector_store %arg5[%c0_29, %c0_30, %c0_31, %c0_32], %22 {strides = array<i32>} : memref<8x2x8x4xf32, #tpu.memory_space<vmem>>, vector<8x2x8x4xf32>,
    %c0_33 = arith.constant 0 : index
    %c0_34 = arith.constant 0 : index
    %c0_35 = arith.constant 0 : index
    %c0_36 = arith.constant 0 : index
    %24 = vector.load %arg5[%c0_33, %c0_34, %c0_35, %c0_36] : memref<8x2x8x4xf32, #tpu.memory_space<vmem>>, vector<8x1x8x4xf32>
    %25 = vector.shape_cast %24 : vector<8x1x8x4xf32> to vector<8x8x4xf32>
    %26 = vector.shape_cast %25 : vector<8x8x4xf32> to vector<64x4xf32>
    %27 = tpu.transpose %26, [1, 0] : vector<64x4xf32> -> vector<4x64xf32>
    %c0_37 = arith.constant 0 : index
    %c0_38 = arith.constant 0 : index
    %c1_39 = arith.constant 1 : index
    %c0_40 = arith.constant 0 : index
    %c0_41 = arith.constant 0 : index
    %28 = vector.load %arg3[%c0_37, %c0_38, %c1_39, %c0_40, %c0_41] : memref<1x2x2x4x64xf32, #tpu.memory_space<vmem>>, vector<1x1x1x4x64xf32>
    %29 = vector.shape_cast %28 : vector<1x1x1x4x64xf32> to vector<4x64xf32>
    %30 = vector.shape_cast %27 : vector<4x64xf32> to vector<1x1x1x4x64xf32>
    tpu.vector_store %arg3[%c0_37, %c0_38, %c1_39, %c0_40, %c0_41], %30 {strides = array<i32>} : memref<1x2x2x4x64xf32, #tpu.memory_space<vmem>>, vector<1x1x1x4x64xf32>,
    %c0_42 = arith.constant 0 : index
    %c1_43 = arith.constant 1 : index
    %c0_44 = arith.constant 0 : index
    %c0_45 = arith.constant 0 : index
    %31 = vector.load %arg5[%c0_42, %c1_43, %c0_44, %c0_45] : memref<8x2x8x4xf32, #tpu.memory_space<vmem>>, vector<8x1x8x4xf32>
    %32 = vector.shape_cast %31 : vector<8x1x8x4xf32> to vector<8x8x4xf32>
    %33 = vector.shape_cast %32 : vector<8x8x4xf32> to vector<64x4xf32>
    %34 = tpu.transpose %33, [1, 0] : vector<64x4xf32> -> vector<4x64xf32>
    %c0_46 = arith.constant 0 : index
    %c1_47 = arith.constant 1 : index
    %c1_48 = arith.constant 1 : index
    %c0_49 = arith.constant 0 : index
    %c0_50 = arith.constant 0 : index
    %35 = vector.load %arg3[%c0_46, %c1_47, %c1_48, %c0_49, %c0_50] : memref<1x2x2x4x64xf32, #tpu.memory_space<vmem>>, vector<1x1x1x4x64xf32>
    %36 = vector.shape_cast %35 : vector<1x1x1x4x64xf32> to vector<4x64xf32>
    %37 = vector.shape_cast %34 : vector<4x64xf32> to vector<1x1x1x4x64xf32>
    tpu.vector_store %arg3[%c0_46, %c1_47, %c1_48, %c0_49, %c0_50], %37 {strides = array<i32>} : memref<1x2x2x4x64xf32, #tpu.memory_space<vmem>>, vector<1x1x1x4x64xf32>,
    return
  }
  func.func @transform_0(%arg0: i32, %arg1: i32) -> (i32, i32, i32) {
    %c0_i32 = arith.constant 0 : i32
    %c0_i32_0 = arith.constant 0 : i32
    return %arg0, %arg1, %c0_i32 : i32, i32, i32
  }
  func.func @transform_1(%arg0: i32, %arg1: i32) -> (i32, i32, i32, i32, i32) {
    %c0_i32 = arith.constant 0 : i32
    %c0_i32_0 = arith.constant 0 : i32
    %c0_i32_1 = arith.constant 0 : i32
    %c0_i32_2 = arith.constant 0 : i32
    return %arg0, %c0_i32, %c0_i32_0, %arg1, %c0_i32_1 : i32, i32, i32, i32, i32
  }
}

</mosaic_0001>

<bundles_post_ra>
// kernel: tpu_custom_call.1
= control target key start
LH: loop header
LB: loop body
LE: loop exit
PB: predicated region body
PF: predicated region fallthrough
CT: control target
= control target key end

     0   :  { %6 = vsyncpa [#allocation5], 0  ;;  %s1055_s0 = inlined_call_operand.hbm [shape: f32[2,4,256], index: 0, kind: input, shape index: {}]   ;;  %s1056_s1 = inlined_call_operand.hbm [shape: f32[2,2,2,4,64], index: 1, kind: output, shape index: {}]  }
   0x1   :  { %8 = vsyncpa [#allocation5 + $0x1], 0 }
   0x2   :  { %9 = vsyncpa [#allocation6], 0 }
   0x3   :  { %11 = vsyncpa [#allocation6 + $0x1], 0  ;;  %s827_s6 = smov 0   ;;  %s829_s7 = smov 0  }
   0x4   :  { %s831_s8 = smov 0   ;;  %s833_s9 = smov 0  }
   0x5   :  { %s835_s10 = smov 0   ;;  %s837_s11 = smov 0  }
   0x6 LB: > { %s617_s12 = sadd.s32 4294967295, %s811_s11   ;;  %s618_s13 = sadd.s32 4294967294, %s811_s11   ;;  %s811_s11 = sphi %s837_s11, %s17_s11   ;;  %s807_s10 = sphi %s835_s10, %s1068_s10   ;;  %s803_s9 = sphi %s833_s9, %s1067_s9   ;;  %s799_s8 = sphi %s831_s8, %s1066_s8   ;;  %s795_s7 = sphi %s829_s7, %s1065_s7   ;;  %s791_s6 = sphi %s827_s6, %s1064_s6  }
   0x7   : > { %s29_s14 = sadd.s32 1, %s807_s10  ;;  %s38_s15 = sadd.s32 1, %s799_s8 }
   0x8   : > { %p31_p0 = scmp.ge.s32.totalorder %s29_s14, 2  ;;  %p45_p1 = scmp.ne.s32.totalorder %s799_s8, %s795_s7 }
   0x9   : > { %p46_p2 = scmp.eq.s32.totalorder %s811_s11, 0  ;;  %p51_p3 = scmp.ne.s32.totalorder %s795_s7, %s791_s6 }
   0xa   : > { %s1070_s14 = smov (%p31_p0, %s29_s14), 0  ;;  %p52_p5 = scmp.eq.s32.totalorder %s617_s12, 0 }
   0xb   : > { %p868_p4 = por %p46_p2, %p45_p1  ;;  %s33_s17 = ssub.s32 %s807_s10, %s1070_s14 }
   0xc   : > { %p77_p6 = scmp.eq.s32.totalorder %s617_s12, 1  ;;  %p36_p7 = scmp.eq.s32.totalorder %s33_s17, 0 }
   0xd   : > { %p874_p8 = por %p52_p5, %p51_p3  ;;  %p83_p10 = scmp.eq.s32.totalorder %s618_s13, 1 }
   0xe   : > { %p878_p9 = por %p77_p6, %p45_p1  ;;  %p649_p13 = scmp.lt.s32.totalorder %s811_s11, 2 }
   0xf   : > { %s883_s20 = scalar_select %p36_p7, %s799_s8, %s38_s15  }
  0x10   : > { %p885_p11 = por %p83_p10, %p51_p3  ;;  %s103_s22 = sand.u32 1, %s799_s8  }
  0x11   : > { %s621_s23 = sshll.u32 %s103_s22, 3  ;;  %s635_s24 = sshll.u32 %s807_s10, 7 }
  0x12   : > { %s1060_s21 = scalar_select %p885_p11, 1, 0 }
  0x13   : > { %s115_s27 = scalar_lea.hbm %s1055_s0, %s635_s24  ;;  %s107_s28 = scalar_lea.vmem [#allocation4], %s621_s23 }
  0x14   : > { %s117_s29 = sshll.u32 %s107_s28, 4  ;;  %p898_p0 = pnand %p649_p13, %p868_p4  ;;  %s118_s29 = int_to_ptr.vmem [resolvable:$true] %s117_s29 }
  0x15   : > { %p624_p1 = scmp.ge.s32.totalorder %s811_s11, 1  ;;  %p122_p2 = scmp.lt.s32.totalorder %s811_s11, 3 }
  0x16   : > { %s104_s2 = scalar_lea.sflag [#allocation5], %s103_s22  ;;  %p705_p3 = pneg %p898_p0 }
  0x17   : > { %s716_s3 = scalar_lea.vmem %s118_s29, 128  ;;  %s813_s4 = smov [#allocation4]  }
  0x18   : > { %p717_p5 = scmp.ne.s32.totalorder %s118_s29, %s716_s3  ;;  %s721_s5 = sshll.u32 %s813_s4, 4  ;;  %s722_s5 = int_to_ptr.vmem [resolvable:$false] %s721_s5 }
  0x19   : > { %s723_s12 = scalar_lea.vmem %s722_s5, 256  ;;  %p724_p10 = scmp.lt.s32.totalorder %s118_s29, %s722_s5 }
  0x1a   : > { %p719_p6 = pnand %p717_p5, %p705_p3  ;;  %p725_p12 = scmp.lt.s32.totalorder %s723_s12, %s716_s3 }
  0x1c   : > { %p720_p7 = pneg %p719_p6  ;;  %p726_p4 = por %p725_p12, %p724_p10 }
  0x1e   : > { %p727_p13 = pnand %p726_p4, %p720_p7 }
  0x20   : > { %730 = shalt.err (!%p727_p13)
}
  0x21   : > { %644 = dma.hbm_to_vmem [thread:$0]  (!%p898_p0), %s115_s27, 128, %s118_s29, %s104_s2  }
  0x22   : > { %p123_p11 = pnand %p624_p1, %p122_p2 }
  0x23   : > { %s913_s13 = sand.u32 (!%p123_p11), 1, %s795_s7  }
  0x24   : > { %126 = sbr.rel (%p123_p11) target bundleno = 476 (0x1dc), region = 24  ;;  %s625_s15 = sshll.u32 (!%p123_p11), %s913_s13, 3 }
  0x25   : > { %s129_s16 = scalar_lea.sflag (!%p123_p11), [#allocation5], %s913_s13  ;;  %s132_s17 = scalar_lea.vmem (!%p123_p11), [#allocation4], %s625_s15 }
  0x29   : > { %782 = dma.done.wait (%p874_p8), %s129_s16, 128  }
  0x2a   : > { %784 = vsyncadd (%p874_p8), %s129_s16, 4294967168  ;;  %v151_v0 = vld [vmem:[%s132_s17] sm:$0xff]  ;;  %vm219_vm0 = vcmask 31744   ;;  %s626_s18 = sshll.u32 %s913_s13, 4  ;;  %vm339_vm1 = vcmask 519168   ;;  %s636_s24 = sshll.u32 %s803_s9, 8 }
  0x2b   : > { %155 = vxpose.xlu0.b32.start.end [1/1] (short) %v151_v0, 128  ;;  %v153_v1 = vcombine.high %v151_v0, %v151_v0  ;;  %s150_s22 = scalar_lea.vmem [#allocation7], %s626_s18  ;;  %s1007_s27 = scalar_lea.hbm %s1056_s1, %s636_s24 }
  0x2c   : > { %s531_s23 = sshll.u32 %s150_s22, 4  ;;  %s517_s28 = scalar_lea.sflag [#allocation6], %s913_s13  ;;  %s1002_s23 = int_to_ptr.vmem [resolvable:$true] %s531_s23 }
  0x2d   : > { %s731_s29 = scalar_lea.vmem %s1002_s23, 256  ;;  %s814_s30 = smov [#allocation7]  }
  0x2e   : > { %p732_p8 = scmp.ne.s32.totalorder %s1002_s23, %s731_s29  ;;  %s735_s9 = sshll.u32 %s814_s30, 4  ;;  %s736_s9 = int_to_ptr.vmem [resolvable:$false] %s735_s9 }
  0x2f   : > { %s737_s2 = scalar_lea.vmem %s736_s9, 512  ;;  %p738_p0 = scmp.lt.s32.totalorder %s1002_s23, %s736_s9 }
  0x30   : > { %p733_p11 = pnand %p732_p8, %p878_p9  ;;  %p739_p1 = scmp.lt.s32.totalorder %s737_s2, %s731_s29 }
  0x32   : > { %p734_p12 = pneg %p733_p11  ;;  %p740_p2 = por %p739_p1, %p738_p0 }
  0x34   : > { %p741_p3 = pnand %p740_p2, %p734_p12 }
  0x68   : > { %187 = vxpose.xlu0.b32.start.end [1/1] (short) %v153_v1, 128 }
  0xa7   : > { %v171_v2 = vpop.trf.xlu0 }
  0xa8   : > { %220 = vst.msk [vmem:[#allocation2] sm:$0xff] %vm219_vm0, %v171_v2 }
  0xab   : > { %v172_v3 = vpop.trf.xlu0 }
  0xac   : > { %221 = vst.msk [vmem:[#allocation2 + $0x8] sm:$0xff] %vm219_vm0, %v172_v3 }
  0xaf   : > { %v173_v4 = vpop.trf.xlu0 }
  0xb0   : > { %222 = vst.msk [vmem:[#allocation2 + $0x10] sm:$0xff] %vm219_vm0, %v173_v4 }
  0xb3   : > { %v174_v5 = vpop.trf.xlu0  ;;  %v252_v6 = vld [vmem:[#allocation2] ss:$2 sm:$0xff]  ;;  %v385_v11 = vld [vmem:[#allocation2 + $0x1] ss:$2 sm:$0xff] }
  0xb4   : > { %223 = vst.msk [vmem:[#allocation2 + $0x18] sm:$0xff] %vm219_vm0, %v174_v5  ;;  %283 = vst.msk [vmem:[#allocation3] sm:$0xff] %vm219_vm0, %v252_v6 }
  0xb7   : > { %v175_v7 = vpop.trf.xlu0 }
  0xb8   : > { %224 = vst.msk [vmem:[#allocation2 + $0x20] sm:$0xff] %vm219_vm0, %v175_v7 }
  0xbb   : > { %v254_v8 = vld [vmem:[#allocation2 + $0x10] ss:$2 sm:$0xff]  ;;  %v176_v9 = vpop.trf.xlu0  ;;  %v299_v10 = vld [vmem:[#allocation3] sm:$0xff]  ;;  %v387_v13 = vld [vmem:[#allocation2 + $0x11] ss:$2 sm:$0xff] }
  0xbc   : > { %284 = vst.msk [vmem:[#allocation3 + $0x8] sm:$0xff] %vm219_vm0, %v254_v8  ;;  %225 = vst.msk [vmem:[#allocation2 + $0x28] sm:$0xff] %vm219_vm0, %v176_v9  ;;  %307 = vxpose.xlu1.b32.start [1/8] (short) (narrow) %v299_v10, 8 }
  0xbd   : > { %416 = vst.msk [vmem:[#allocation3] sm:$0xff] %vm219_vm0, %v385_v11 }
  0xbf   : > { %v177_v12 = vpop.trf.xlu0 }
  0xc0   : > { %226 = vst.msk [vmem:[#allocation2 + $0x30] sm:$0xff] %vm219_vm0, %v177_v12 }
  0xc3   : > { %v178_v14 = vpop.trf.xlu0  ;;  %v256_v15 = vld [vmem:[#allocation2 + $0x20] ss:$2 sm:$0xff]  ;;  %v389_v21 = vld [vmem:[#allocation2 + $0x21] ss:$2 sm:$0xff] }
  0xc4   : > { %v931_v16 = vld [vmem:[#allocation3 + $0x8] sm:$0xff]  ;;  %227 = vst.msk [vmem:[#allocation2 + $0x38] sm:$0xff] %vm219_vm0, %v178_v14  ;;  %285 = vst.msk [vmem:[#allocation3 + $0x10] sm:$0xff] %vm219_vm0, %v256_v15 }
  0xc5   : > { %417 = vst.msk [vmem:[#allocation3 + $0x8] sm:$0xff] %vm219_vm0, %v387_v13 }
  0xc7   : > { %v179_v17 = vpop.trf.xlu0 }
  0xc8   : > { %228 = vst.msk [vmem:[#allocation2 + $0x40] sm:$0xff] %vm219_vm0, %v179_v17 }
  0xcb   : > { %v258_v18 = vld [vmem:[#allocation2 + $0x30] ss:$2 sm:$0xff]  ;;  %v180_v19 = vpop.trf.xlu0  ;;  %v391_v24 = vld [vmem:[#allocation2 + $0x31] ss:$2 sm:$0xff] }
  0xcc   : > { %v300_v20 = vld [vmem:[#allocation3 + $0x10] sm:$0xff]  ;;  %286 = vst.msk [vmem:[#allocation3 + $0x18] sm:$0xff] %vm219_vm0, %v258_v18  ;;  %229 = vst.msk [vmem:[#allocation2 + $0x48] sm:$0xff] %vm219_vm0, %v180_v19  ;;  %v474_v22 = vld [vmem:[#allocation3 + $0x8] sm:$0xff] }
  0xcd   : > { %308 = vxpose.xlu1.b32.cont [2/8] (short) (narrow) %v300_v20, 8  ;;  %418 = vst.msk [vmem:[#allocation3 + $0x10] sm:$0xff] %vm219_vm0, %v389_v21  ;;  %482 = vxpose.xlu0.b32.start [1/8] (short) (narrow) %v474_v22, 8 }
  0xcf   : > { %v181_v23 = vpop.trf.xlu0 }
  0xd0   : > { %230 = vst.msk [vmem:[#allocation2 + $0x50] sm:$0xff] %vm219_vm0, %v181_v23 }
  0xd3   : > { %v182_v25 = vpop.trf.xlu0  ;;  %v260_v26 = vld [vmem:[#allocation2 + $0x40] ss:$2 sm:$0xff]  ;;  %v941_v27 = vld [vmem:[#allocation3 + $0x18] sm:$0xff]  ;;  %v393_v32 = vld [vmem:[#allocation2 + $0x41] ss:$2 sm:$0xff] }
  0xd4   : > { %231 = vst.msk [vmem:[#allocation2 + $0x58] sm:$0xff] %vm219_vm0, %v182_v25  ;;  %287 = vst.msk [vmem:[#allocation3 + $0x20] sm:$0xff] %vm219_vm0, %v260_v26 }
  0xd5   : > { %419 = vst.msk [vmem:[#allocation3 + $0x18] sm:$0xff] %vm219_vm0, %v391_v24 }
  0xd7   : > { %v183_v28 = vpop.trf.xlu0 }
  0xd8   : > { %232 = vst.msk [vmem:[#allocation2 + $0x60] sm:$0xff] %vm219_vm0, %v183_v28  ;;  %v432_v28 = vld [vmem:[#allocation3] sm:$0xff] }
  0xdb   : > { %v262_v29 = vld [vmem:[#allocation2 + $0x50] ss:$2 sm:$0xff]  ;;  %v184_v30 = vpop.trf.xlu0  ;;  %v301_v31 = vld [vmem:[#allocation3 + $0x20] sm:$0xff]  ;;  %v395_v35 = vld [vmem:[#allocation2 + $0x51] ss:$2 sm:$0xff] }
  0xdc   : > { %288 = vst.msk [vmem:[#allocation3 + $0x28] sm:$0xff] %vm219_vm0, %v262_v29  ;;  %233 = vst.msk [vmem:[#allocation2 + $0x68] sm:$0xff] %vm219_vm0, %v184_v30  ;;  %309 = vxpose.xlu1.b32.cont [3/8] (short) (narrow) %v301_v31, 8  ;;  %v475_v33 = vld [vmem:[#allocation3 + $0x18] sm:$0xff] }
  0xdd   : > { %420 = vst.msk [vmem:[#allocation3 + $0x20] sm:$0xff] %vm219_vm0, %v393_v32  ;;  %483 = vxpose.xlu0.b32.cont [2/8] (short) (narrow) %v475_v33, 8 }
  0xdf   : > { %v185_v34 = vpop.trf.xlu0 }
  0xe0   : > { %234 = vst.msk [vmem:[#allocation2 + $0x70] sm:$0xff] %vm219_vm0, %v185_v34 }
  0xe3   : > { %v186_v36 = vpop.trf.xlu0  ;;  %v264_v37 = vld [vmem:[#allocation2 + $0x60] ss:$2 sm:$0xff]  ;;  %v397_v43 = vld [vmem:[#allocation2 + $0x61] ss:$2 sm:$0xff] }
  0xe4   : > { %v951_v38 = vld [vmem:[#allocation3 + $0x28] sm:$0xff]  ;;  %235 = vst.msk [vmem:[#allocation2 + $0x78] sm:$0xff] %vm219_vm0, %v186_v36  ;;  %289 = vst.msk [vmem:[#allocation3 + $0x30] sm:$0xff] %vm219_vm0, %v264_v37  ;;  %v434_v29 = vld [vmem:[#allocation3 + $0x20] sm:$0xff] }
  0xe5   : > { %421 = vst.msk [vmem:[#allocation3 + $0x28] sm:$0xff] %vm219_vm0, %v395_v35 }
  0xe7   : > { %v203_v39 = vpop.trf.xlu0 }
  0xe8   : > { %236 = vst.msk [vmem:[#allocation2 + $0x80] sm:$0xff] %vm219_vm0, %v203_v39 }
  0xeb   : > { %v266_v40 = vld [vmem:[#allocation2 + $0x70] ss:$2 sm:$0xff]  ;;  %v204_v41 = vpop.trf.xlu0  ;;  %v399_v46 = vld [vmem:[#allocation2 + $0x71] ss:$2 sm:$0xff] }
  0xec   : > { %v302_v42 = vld [vmem:[#allocation3 + $0x30] sm:$0xff]  ;;  %290 = vst.msk [vmem:[#allocation3 + $0x38] sm:$0xff] %vm219_vm0, %v266_v40  ;;  %237 = vst.msk [vmem:[#allocation2 + $0x88] sm:$0xff] %vm219_vm0, %v204_v41  ;;  %v476_v44 = vld [vmem:[#allocation3 + $0x28] sm:$0xff] }
  0xed   : > { %310 = vxpose.xlu1.b32.cont [4/8] (short) (narrow) %v302_v42, 8  ;;  %422 = vst.msk [vmem:[#allocation3 + $0x30] sm:$0xff] %vm219_vm0, %v397_v43  ;;  %484 = vxpose.xlu0.b32.cont [3/8] (short) (narrow) %v476_v44, 8 }
  0xef   : > { %v205_v45 = vpop.trf.xlu0 }
  0xf0   : > { %238 = vst.msk [vmem:[#allocation2 + $0x90] sm:$0xff] %vm219_vm0, %v205_v45 }
  0xf3   : > { %v206_v47 = vpop.trf.xlu0  ;;  %v961_v48 = vld [vmem:[#allocation3 + $0x38] sm:$0xff]  ;;  %v268_v49 = vld [vmem:[#allocation2 + $0x80] ss:$2 sm:$0xff]  ;;  %v401_v55 = vld [vmem:[#allocation2 + $0x81] ss:$2 sm:$0xff] }
  0xf4   : > { %239 = vst.msk [vmem:[#allocation2 + $0x98] sm:$0xff] %vm219_vm0, %v206_v47  ;;  %423 = vst.msk [vmem:[#allocation3 + $0x38] sm:$0xff] %vm219_vm0, %v399_v46 }
  0xf5   : > { %291 = vst.msk [vmem:[#allocation3 + $0x40] sm:$0xff] %vm219_vm0, %v268_v49 }
  0xf7   : > { %v207_v50 = vpop.trf.xlu0 }
  0xf8   : > { %240 = vst.msk [vmem:[#allocation2 + $0xa0] sm:$0xff] %vm219_vm0, %v207_v50 }
  0xfb   : > { %v270_v51 = vld [vmem:[#allocation2 + $0x90] ss:$2 sm:$0xff]  ;;  %v208_v52 = vpop.trf.xlu0  ;;  %v403_v57 = vld [vmem:[#allocation2 + $0x91] ss:$2 sm:$0xff] }
  0xfc   : > { %v477_v53 = vld [vmem:[#allocation3 + $0x38] sm:$0xff]  ;;  %292 = vst.msk [vmem:[#allocation3 + $0x48] sm:$0xff] %vm219_vm0, %v270_v51  ;;  %241 = vst.msk [vmem:[#allocation2 + $0xa8] sm:$0xff] %vm219_vm0, %v208_v52  ;;  %v303_v54 = vld [vmem:[#allocation3 + $0x40] sm:$0xff] }
  0xfd   : > { %485 = vxpose.xlu0.b32.cont [4/8] (short) (narrow) %v477_v53, 8  ;;  %311 = vxpose.xlu1.b32.cont [5/8] (short) (narrow) %v303_v54, 8  ;;  %424 = vst.msk [vmem:[#allocation3 + $0x40] sm:$0xff] %vm219_vm0, %v401_v55 }
  0xff   : > { %v209_v56 = vpop.trf.xlu0 }
 0x100   : > { %242 = vst.msk [vmem:[#allocation2 + $0xb0] sm:$0xff] %vm219_vm0, %v209_v56 }
 0x103   : > { %v210_v58 = vpop.trf.xlu0  ;;  %v971_v59 = vld [vmem:[#allocation3 + $0x48] sm:$0xff] }
 0x104   : > { %v272_v60 = vld [vmem:[#allocation2 + $0xa0] ss:$2 sm:$0xff]  ;;  %243 = vst.msk [vmem:[#allocation2 + $0xb8] sm:$0xff] %vm219_vm0, %v210_v58  ;;  %425 = vst.msk [vmem:[#allocation3 + $0x48] sm:$0xff] %vm219_vm0, %v403_v57  ;;  %v405_v2 = vld [vmem:[#allocation2 + $0xa1] ss:$2 sm:$0xff] }
 0x105   : > { %293 = vst.msk [vmem:[#allocation3 + $0x50] sm:$0xff] %vm219_vm0, %v272_v60  ;;  %v436_v30 = vld [vmem:[#allocation3 + $0x40] sm:$0xff] }
 0x107   : > { %v211_v61 = vpop.trf.xlu0 }
 0x108   : > { %244 = vst.msk [vmem:[#allocation2 + $0xc0] sm:$0xff] %vm219_vm0, %v211_v61 }
 0x10b   : > { %v274_v62 = vld [vmem:[#allocation2 + $0xb0] ss:$2 sm:$0xff]  ;;  %v212_v63 = vpop.trf.xlu0  ;;  %v478_v0 = vld [vmem:[#allocation3 + $0x48] sm:$0xff]  ;;  %v407_v4 = vld [vmem:[#allocation2 + $0xb1] ss:$2 sm:$0xff] }
 0x10c   : > { %294 = vst.msk [vmem:[#allocation3 + $0x58] sm:$0xff] %vm219_vm0, %v274_v62  ;;  %245 = vst.msk [vmem:[#allocation2 + $0xc8] sm:$0xff] %vm219_vm0, %v212_v63  ;;  %486 = vxpose.xlu0.b32.cont [5/8] (short) (narrow) %v478_v0, 8  ;;  %v304_v1 = vld [vmem:[#allocation3 + $0x50] sm:$0xff] }
 0x10d   : > { %312 = vxpose.xlu1.b32.cont [6/8] (short) (narrow) %v304_v1, 8  ;;  %426 = vst.msk [vmem:[#allocation3 + $0x50] sm:$0xff] %vm219_vm0, %v405_v2 }
 0x10f   : > { %v213_v3 = vpop.trf.xlu0 }
 0x110   : > { %246 = vst.msk [vmem:[#allocation2 + $0xd0] sm:$0xff] %vm219_vm0, %v213_v3 }
 0x113   : > { %v214_v5 = vpop.trf.xlu0  ;;  %v347_v6 = vld [vmem:[#allocation3 + $0x58] sm:$0xff]  ;;  %v276_v7 = vld [vmem:[#allocation2 + $0xc0] ss:$2 sm:$0xff]  ;;  %v409_v13 = vld [vmem:[#allocation2 + $0xc1] ss:$2 sm:$0xff] }
 0x114   : > { %247 = vst.msk [vmem:[#allocation2 + $0xd8] sm:$0xff] %vm219_vm0, %v214_v5  ;;  %427 = vst.msk [vmem:[#allocation3 + $0x58] sm:$0xff] %vm219_vm0, %v407_v4  ;;  %v437_v31 = vld [vmem:[#allocation3 + $0x50] sm:$0xff] }
 0x115   : > { %295 = vst.msk [vmem:[#allocation3 + $0x60] sm:$0xff] %vm219_vm0, %v276_v7 }
 0x117   : > { %v215_v8 = vpop.trf.xlu0 }
 0x118   : > { %248 = vst.msk [vmem:[#allocation2 + $0xe0] sm:$0xff] %vm219_vm0, %v215_v8 }
 0x11b   : > { %v278_v9 = vld [vmem:[#allocation2 + $0xd0] ss:$2 sm:$0xff]  ;;  %v216_v10 = vpop.trf.xlu0  ;;  %v411_v15 = vld [vmem:[#allocation2 + $0xd1] ss:$2 sm:$0xff] }
 0x11c   : > { %v479_v11 = vld [vmem:[#allocation3 + $0x58] sm:$0xff]  ;;  %296 = vst.msk [vmem:[#allocation3 + $0x68] sm:$0xff] %vm219_vm0, %v278_v9  ;;  %249 = vst.msk [vmem:[#allocation2 + $0xe8] sm:$0xff] %vm219_vm0, %v216_v10  ;;  %v305_v12 = vld [vmem:[#allocation3 + $0x60] sm:$0xff] }
 0x11d   : > { %487 = vxpose.xlu0.b32.cont [6/8] (short) (narrow) %v479_v11, 8  ;;  %313 = vxpose.xlu1.b32.cont [7/8] (short) (narrow) %v305_v12, 8  ;;  %428 = vst.msk [vmem:[#allocation3 + $0x60] sm:$0xff] %vm219_vm0, %v409_v13 }
 0x11f   : > { %v217_v14 = vpop.trf.xlu0 }
 0x120   : > { %250 = vst.msk [vmem:[#allocation2 + $0xf0] sm:$0xff] %vm219_vm0, %v217_v14 }
 0x123   : > { %v348_v17 = vld [vmem:[#allocation3 + $0x68] sm:$0xff]  ;;  %v218_v19 = vpop.trf.xlu0 }
 0x124   : > { %v280_v18 = vld [vmem:[#allocation2 + $0xe0] ss:$2 sm:$0xff]  ;;  %429 = vst.msk [vmem:[#allocation3 + $0x68] sm:$0xff] %vm219_vm0, %v411_v15  ;;  %251 = vst.msk [vmem:[#allocation2 + $0xf8] sm:$0xff] %vm219_vm0, %v218_v19  ;;  %v413_v20 = vld [vmem:[#allocation2 + $0xe1] ss:$2 sm:$0xff] }
 0x125   : > { %297 = vst.msk [vmem:[#allocation3 + $0x70] sm:$0xff] %vm219_vm0, %v280_v18  ;;  %v438_v32 = vld [vmem:[#allocation3 + $0x60] sm:$0xff] }
 0x12b   : > { %v480_v21 = vld [vmem:[#allocation3 + $0x68] sm:$0xff]  ;;  %v282_v23 = vld [vmem:[#allocation2 + $0xf0] ss:$2 sm:$0xff]  ;;  %v415_v24 = vld [vmem:[#allocation2 + $0xf1] ss:$2 sm:$0xff] }
 0x12c   : > { %v306_v22 = vld [vmem:[#allocation3 + $0x70] sm:$0xff]  ;;  %488 = vxpose.xlu0.b32.cont [7/8] (short) (narrow) %v480_v21, 8  ;;  %298 = vst.msk [vmem:[#allocation3 + $0x78] sm:$0xff] %vm219_vm0, %v282_v23 }
 0x12d   : > { %314 = vxpose.xlu1.b32.end [8/8] (short) (narrow) %v306_v22, 8  ;;  %430 = vst.msk [vmem:[#allocation3 + $0x70] sm:$0xff] %vm219_vm0, %v413_v20 }
 0x131   : > { %350 = vxpose.xlu1.b32.start [1/8] (short) (narrow) %v931_v16, 8  ;;  %v433_v16 = vld [vmem:[#allocation3 + $0x10] sm:$0xff] }
 0x133   : > { %v349_v25 = vld [vmem:[#allocation3 + $0x78] sm:$0xff] }
 0x134   : > { %431 = vst.msk [vmem:[#allocation3 + $0x78] sm:$0xff] %vm219_vm0, %v415_v24  ;;  %v439_v33 = vld [vmem:[#allocation3 + $0x70] sm:$0xff] }
 0x135   : > { %351 = vxpose.xlu1.b32.cont [2/8] (short) (narrow) %v941_v27, 8  ;;  %v435_v27 = vld [vmem:[#allocation3 + $0x30] sm:$0xff] }
 0x139   : > { %352 = vxpose.xlu1.b32.cont [3/8] (short) (narrow) %v951_v38, 8 }
 0x13b   : > { %v481_v26 = vld [vmem:[#allocation3 + $0x78] sm:$0xff] }
 0x13c   : > { %489 = vxpose.xlu0.b32.end [8/8] (short) (narrow) %v481_v26, 8 }
 0x13d   : > { %353 = vxpose.xlu1.b32.cont [4/8] (short) (narrow) %v961_v48, 8 }
 0x141   : > { %354 = vxpose.xlu1.b32.cont [5/8] (short) (narrow) %v971_v59, 8 }
 0x145   : > { %355 = vxpose.xlu1.b32.cont [6/8] (short) (narrow) %v347_v6, 8 }
 0x149   : > { %356 = vxpose.xlu1.b32.cont [7/8] (short) (narrow) %v348_v17, 8 }
 0x14d   : > { %357 = vxpose.xlu1.b32.end [8/8] (short) (narrow) %v349_v25, 8 }
 0x151   : > { %440 = vxpose.xlu1.b32.start [1/8] (short) (narrow) %v432_v28, 8 }
 0x155   : > { %441 = vxpose.xlu1.b32.cont [2/8] (short) (narrow) %v433_v16, 8 }
 0x159   : > { %442 = vxpose.xlu1.b32.cont [3/8] (short) (narrow) %v434_v29, 8 }
 0x15d   : > { %443 = vxpose.xlu1.b32.cont [4/8] (short) (narrow) %v435_v27, 8 }
 0x161   : > { %444 = vxpose.xlu1.b32.cont [5/8] (short) (narrow) %v436_v30, 8 }
 0x165   : > { %445 = vxpose.xlu1.b32.cont [6/8] (short) (narrow) %v437_v31, 8 }
 0x169   : > { %446 = vxpose.xlu1.b32.cont [7/8] (short) (narrow) %v438_v32, 8 }
 0x16d   : > { %447 = vxpose.xlu1.b32.end [8/8] (short) (narrow) %v439_v33, 8 }
 0x18d   : > { %v323_v34 = vpop.trf.xlu1 }
 0x18e   : > { %340 = vst.msk [vmem:[%s150_s22] sm:$0xf] %vm339_vm1, %v323_v34 }
 0x19c   : > { %v498_v35 = vpop.trf.xlu0 }
 0x19d   : > { %629 = vst.msk [vmem:[%s150_s22 + $0xc] sm:$0xf] %vm339_vm1, %v498_v35 }
 0x1ad   : > { %v366_v36 = vpop.trf.xlu1 }
 0x1ae   : > { %627 = vst.msk [vmem:[%s150_s22 + $0x8] sm:$0xf] %vm339_vm1, %v366_v36 }
 0x1cd   : > { %v456_v37 = vpop.trf.xlu1 }
 0x1ce   : > { %628 = vst.msk [vmem:[%s150_s22 + $0x4] sm:$0xf] %vm339_vm1, %v456_v37 }
 0x1cf   : > { %744 = shalt.err (!%p741_p3)
}
 0x1d0   : > { %s745_s3 = scalar_lea.hbm %s1007_s27, 256  ;;  %s749_s12 = scalar_lea.hbm %s1056_s1, 512 }
 0x1d1   : > { %p746_p5 = scmp.ne.s32.totalorder %s1007_s27, %s745_s3  ;;  %p750_p10 = scmp.lt.s32.totalorder %s1007_s27, %s1056_s1 }
 0x1d2   : > { %p751_p4 = scmp.lt.s32.totalorder %s749_s12, %s745_s3 }
 0x1d3   : > { %p747_p6 = pnand %p746_p5, %p878_p9 }
 0x1d4   : > { %p752_p13 = por %p751_p4, %p750_p10 }
 0x1d5   : > { %p748_p7 = pneg %p747_p6 }
 0x1d7   : > { %p753_p8 = pnand %p752_p13, %p748_p7 }
 0x1d9   : > { %756 = shalt.err (!%p753_p8)
}
 0x1da   : > { %s815_s17 = smov 64   ;;  %s816_s18 = smov 4  }
 0x1db   : > { %639 = dma.vmem_to_hbm [thread:$0]  (%p878_p9), %s1002_s23, 256, %s1007_s27, %s517_s28, %s815_s17, %s815_s17, %s816_s18  }
 0x1dc PF: > { %s546_s22 = sand.u32 1, %s791_s6   ;;  %p1062_p11 = scmp.ne.s32.totalorder %s1060_s21, 0 }
 0x1dd   : > { %p1063_p12 = scmp.ge.s32.totalorder %s811_s11, 2  ;;  %s547_s24 = scalar_lea.sflag [#allocation6], %s546_s22 }
 0x1df   : > { %p646_p0 = pnand %p1063_p12, %p1062_p11 }
 0x1e1   : > { %p647_p1 = pneg %p646_p0 }
 0x1e3   : > { %786 = dma.done.wait (%p647_p1), %s547_s24, 256  }
 0x1e4   : > { %788 = vsyncadd (%p647_p1), %s547_s24, 4294967040  ;;  %s17_s11 = sadd.s32 1, %s811_s11   ;;  %s1064_s6 = smov %s795_s7 }
 0x1e5   : > { %p14_p2 = scmp.ge.s32.totalorder %s17_s11, 4   ;;  %s1065_s7 = smov %s799_s8 }
 0x1e6   : > { %s1066_s8 = smov %s883_s20  ;;  %s1067_s9 = smov %s807_s10 }
 0x1e7   : > { %s1068_s10 = smov %s1070_s14  ;;  %16 = sbr.rel (!%p14_p2) target bundleno = 6 (0x6), region = 104 }
 0x1ec   :  { %552 = vsyncpa [#allocation5], 1 }
 0x1ed   :  { %554 = vsyncpa [#allocation5 + $0x1], 1 }
 0x1ee   :  { %555 = vsyncpa [#allocation6], 1 }
 0x1ef   :  { %557 = vsyncpa [#allocation6 + $0x1], 1 }

</bundles_post_ra>
